<compile_context>
chip_gen: v7x
topology: tpu7x:2x2x1
jax: 0.10.0
libtpu: 0.0.40
codegen_flags: <defaults>
</compile_context>

<pallas_src>
import math

import jax
import jax.numpy as jnp
from jax.experimental import pallas as pl
from jax.experimental.pallas import tpu as pltpu


# ---------------------------------------------------------------------------
# Kernel
# ---------------------------------------------------------------------------
def make_fusion_kernel(num_feats: int, embed_dim: int, eps: float = 1e-5):
    L, E = num_feats, embed_dim

    def kernel(f_ref, w_ref, dblk_ref, wo_ref, bo_ref, gamma_ref, beta_ref, out_ref):
        f = f_ref[...]                      # (B, d_total+1) bf16; last column is 1.0 (bias fold)
        dblk = dblk_ref[...]                # (L*E, L*E) bf16 block-diag head-sum/broadcast matrix

        # Query slab [q_0 | ... | q_{L-1}]; modality Linear, QKV in-proj, 1/sqrt(Dh) query
        # scale and every bias are folded into w_ref at prep time (single bf16 MXU dot,
        # f32 accumulation).
        q = jnp.dot(f, w_ref[0], preferred_element_type=jnp.float32)           # (B, L*E) f32

        # Scores: for key modality j, segment i of s[j] holds the per-head score <q_i, k_j>
        # broadcast across that head's Dh lanes (block-diag ones matmul; same RHS for all j).
        s = []
        for j in range(L):
            k_j = jnp.dot(f, w_ref[1 + j], preferred_element_type=jnp.float32)  # [k_j]*L tiled
            s.append(jnp.dot((q * k_j).astype(jnp.bfloat16), dblk,
                             preferred_element_type=jnp.float32))               # (B, L*E)

        # Softmax over the L key modalities: reductions over j are plain VPU ops between
        # full-width (B, L*E) slabs (no cross-lane work).
        m = s[0]
        for j in range(1, L):
            m = jnp.maximum(m, s[j])
        p = [jnp.exp(s_j - m) for s_j in s]
        denom = p[0]
        for j in range(1, L):
            denom = denom + p[j]
        inv = pl.reciprocal(denom)          # exact (softmax over only L=3 terms)

        ctx = p[0] * jnp.dot(f, w_ref[1 + L], preferred_element_type=jnp.float32)
        for j in range(1, L):
            v_j = jnp.dot(f, w_ref[1 + L + j], preferred_element_type=jnp.float32)
            ctx = ctx + p[j] * v_j
        ctx = ctx * inv                     # (B, L*E) = [ctx_0 | ... | ctx_{L-1}]

        # Mean over query modalities + attention output projection folded into one matmul
        # (wo stacked L times, pre-scaled by 1/L at prep time).
        o = jnp.dot(ctx.astype(jnp.bfloat16), wo_ref[...],
                    preferred_element_type=jnp.float32) + bo_ref[...]           # (B, E) f32

        # LayerNorm (f32).
        mu = jnp.mean(o, axis=-1, keepdims=True)
        var = jnp.mean((o - mu) ** 2, axis=-1, keepdims=True)
        out_ref[...] = (o - mu) * jax.lax.rsqrt(var + eps) * gamma_ref[...] + beta_ref[...]

    return kernel


# ---------------------------------------------------------------------------
# Param prep (one-time weight folding) + wrapper
# ---------------------------------------------------------------------------
def prepare_fused_params(params, num_heads: int):
    """Fold Linear projections + QKV in-proj (+ scale, + biases) into bf16 weight slabs."""
    E = params['gamma'].shape[-1]
    L = len(params['wp'])
    Dh = E // num_heads
    scale = 1.0 / math.sqrt(Dh)

    dims = [w.shape[0] for w in params['wp']]
    d_total = sum(dims)
    offs = [sum(dims[:m]) for m in range(L)]

    w_in = {'q': params['wq'] * scale, 'k': params['wk'], 'v': params['wv']}
    b_in = {'q': params['bq'] * scale, 'k': params['bk'], 'v': params['bv']}

    def fold(t, m):
        # (d_total+1, E): rows for modality m = wp_m @ W_t, last (bias) row = bp_m @ W_t + b_t
        w = jnp.zeros((d_total + 1, E), jnp.float32)
        w = w.at[offs[m]:offs[m] + dims[m], :].set(params['wp'][m] @ w_in[t])
        w = w.at[d_total, :].set((params['bp'][m] @ w_in[t] + b_in[t])[0])
        return w

    w_q = jnp.concatenate([fold('q', i) for i in range(L)], axis=1)           # -> [q_0|...|q_L-1]
    w_k = [jnp.concatenate([fold('k', j)] * L, axis=1) for j in range(L)]     # -> [k_j]*L
    w_v = [jnp.concatenate([fold('v', j)] * L, axis=1) for j in range(L)]     # -> [v_j]*L
    w_stack = jnp.stack([w_q] + w_k + w_v, axis=0).astype(jnp.bfloat16)       # (1+2L, d+1, L*E)

    # Block-diag ones: sums the Dh lanes of each head and broadcasts the score back.
    lane = jnp.arange(L * E)
    dblk = (lane[:, None] // Dh == lane[None, :] // Dh).astype(jnp.bfloat16)  # (L*E, L*E)

    # Mean over modalities folded into the stacked output projection.
    wo_stack = (jnp.concatenate([params['wo']] * L, axis=0) / L).astype(jnp.bfloat16)  # (L*E, E)

    return dict(w_stack=w_stack, dblk=dblk, wo_stack=wo_stack,
                bo=params['bo'], gamma=params['gamma'], beta=params['beta'],
                num_feats=L, embed_dim=E, d_total=d_total)


def _default_block_b(B: int) -> int:
    # Cap blocks at 512 rows and keep >=4 grid steps for large batches so the "parallel"
    # batch axis gives each v7x TensorCore >=2 pipelined steps (DMA overlaps compute) while
    # bounding the f32 working set; tiny batches run in a single step.
    if B <= 128:
        return B
    blk = min(512, -(-B // 4))
    blk = -(-blk // 8) * 8              # sublane multiple
    return min(blk, B)


def feature_fusion(features, fused, *, block_b=None):
    """features: list of (B, dim_i) arrays.  fused: output of prepare_fused_params."""
    B = features[0].shape[0]
    E = fused['embed_dim']
    L = fused['num_feats']

    # One lane-dense bf16 DMA stream; trailing 1.0 column carries every folded bias.
    ones = jnp.ones((B, 1), jnp.float32)
    f_cat = jnp.concatenate(list(features) + [ones], axis=1).astype(jnp.bfloat16)
    d1 = f_cat.shape[1]

    if block_b is None:
        block_b = _default_block_b(B)
    grid = (pl.cdiv(B, block_b),)

    def const_spec(arr):
        nd = arr.ndim
        return pl.BlockSpec(arr.shape, lambda b, _n=nd: (0,) * _n)

    in_specs = [
        pl.BlockSpec((block_b, d1), lambda b: (b, 0)),
        const_spec(fused['w_stack']),
        const_spec(fused['dblk']),
        const_spec(fused['wo_stack']),
        const_spec(fused['bo']),
        const_spec(fused['gamma']),
        const_spec(fused['beta']),
    ]
    out_spec = pl.BlockSpec((block_b, E), lambda b: (b, 0))

    return pl.pallas_call(
        make_fusion_kernel(L, E),
        out_shape=jax.ShapeDtypeStruct((B, E), jnp.float32),
        grid_spec=pltpu.PrefetchScalarGridSpec(
            num_scalar_prefetch=0,
            grid=grid,
            in_specs=in_specs,
            out_specs=out_spec,
        ),
        compiler_params=pltpu.CompilerParams(
            dimension_semantics=("parallel",),
            vmem_limit_bytes=32 * 1024 * 1024,
        ),
    )(f_cat, fused['w_stack'], fused['dblk'], fused['wo_stack'],
      fused['bo'], fused['gamma'], fused['beta'])


# ---------------------------------------------------------------------------
# Pure-JAX reference (torch.nn.MultiheadAttention eval semantics) + param init
# ---------------------------------------------------------------------------
def feature_fusion_ref(features, params, *, num_heads=8, eps=1e-5):
    proj = [f @ w + b for f, w, b in zip(features, params['wp'], params['bp'])]
    x = jnp.stack(proj, axis=0)                                    # (L, B, E)
    L, B, E = x.shape
    Dh = E // num_heads

    q = x @ params['wq'] + params['bq']
    k = x @ params['wk'] + params['bk']
    v = x @ params['wv'] + params['bv']

    def split(t):
        return t.reshape(L, B, num_heads, Dh).transpose(1, 2, 0, 3)   # (B, H, L, Dh)

    qh, kh, vh = split(q), split(k), split(v)
    scores = jnp.einsum('bhqd,bhkd->bhqk', qh, kh) / math.sqrt(Dh)
    p = jax.nn.softmax(scores, axis=-1)
    o = jnp.einsum('bhqk,bhkd->bhqd', p, vh)
    o = o.transpose(2, 0, 1, 3).reshape(L, B, E)
    o = o @ params['wo'] + params['bo']

    combined = o.mean(axis=0)
    mu = combined.mean(axis=-1, keepdims=True)
    var = ((combined - mu) ** 2).mean(axis=-1, keepdims=True)
    normed = (combined - mu) / jnp.sqrt(var + eps)
    return normed * params['gamma'] + params['beta']


def init_params(key, input_dims, output_dim):
    n = len(input_dims)
    keys = iter(jax.random.split(key, 2 * n + 8))
    params = {}
    params['wp'] = [0.15 * jax.random.normal(next(keys), (d, output_dim), jnp.float32)
                    for d in input_dims]
    params['bp'] = [0.05 * jax.random.normal(next(keys), (1, output_dim), jnp.float32)
                    for _ in input_dims]
    for name in ['wq', 'wk', 'wv', 'wo']:
        params[name] = 0.15 * jax.random.normal(next(keys), (output_dim, output_dim), jnp.float32)
    for name in ['bq', 'bk', 'bv', 'bo']:
        params[name] = 0.05 * jax.random.normal(next(keys), (1, output_dim), jnp.float32)
    params['gamma'] = jnp.ones((1, output_dim), jnp.float32)
    params['beta'] = jnp.zeros((1, output_dim), jnp.float32)
    return params


if __name__ == "__main__":
    key = jax.random.PRNGKey(0)
    input_dims = [24, 48, 32]          # three modalities with different feature dims
    output_dim = 32                    # embed_dim, num_heads=8 -> head_dim=4
    batch = 64

    kf, kp = jax.random.split(key)
    fkeys = jax.random.split(kf, len(input_dims))
    features = [jax.random.normal(fk, (batch, d), jnp.float32)
                for fk, d in zip(fkeys, input_dims)]
    params = init_params(kp, input_dims, output_dim)

    fused = prepare_fused_params(params, num_heads=8)   # one-time weight folding
    out = feature_fusion(features, fused, block_b=16)   # 4 grid steps -> exercises pipeline
    out = jax.block_until_ready(out)

    ref = feature_fusion_ref(features, params, num_heads=8)
    assert out.shape == (batch, output_dim)
    err = float(jnp.max(jnp.abs(out - ref)))
    # bf16 MXU operands (f32 accumulation) + LayerNorm 1/sigma amplification -> tolerance
    # is looser than pure-f32; elementwise/softmax math itself is f32.
    assert jnp.allclose(out, ref, atol=3e-2, rtol=3e-2), err
    print("KERNEL_OK")
</pallas_src>

<mosaic_0001>
module attributes {stable_mosaic.version = 11 : i64} {
  func.func @kernel(%arg0: i32, %arg1: memref<16x105xbf16, #tpu.memory_space<vmem>>, %arg2: memref<7x105x96xbf16, #tpu.memory_space<vmem>>, %arg3: memref<96x96xbf16, #tpu.memory_space<vmem>>, %arg4: memref<96x32xbf16, #tpu.memory_space<vmem>>, %arg5: memref<1x32xf32, #tpu.memory_space<vmem>>, %arg6: memref<1x32xf32, #tpu.memory_space<vmem>>, %arg7: memref<1x32xf32, #tpu.memory_space<vmem>>, %arg8: memref<16x32xf32, #tpu.memory_space<vmem>>) attributes {dimension_semantics = [#tpu.dimension_semantics<parallel>], iteration_bounds = array<i64: 4>, scalar_prefetch = 0 : i64, scratch_operands = 0 : i64, tpu.core_type = #tpu.core_type<tc>, window_params = [{transform_indices = @transform_0, window_bounds = array<i64: 16, 105>}, {pipeline_mode = #tpu.pipeline_mode<synchronous>, transform_indices = @transform_1, window_bounds = array<i64: 7, 105, 96>}, {pipeline_mode = #tpu.pipeline_mode<synchronous>, transform_indices = @transform_2, window_bounds = array<i64: 96, 96>}, {pipeline_mode = #tpu.pipeline_mode<synchronous>, transform_indices = @transform_3, window_bounds = array<i64: 96, 32>}, {pipeline_mode = #tpu.pipeline_mode<synchronous>, transform_indices = @transform_4, window_bounds = array<i64: 1, 32>}, {pipeline_mode = #tpu.pipeline_mode<synchronous>, transform_indices = @transform_5, window_bounds = array<i64: 1, 32>}, {pipeline_mode = #tpu.pipeline_mode<synchronous>, transform_indices = @transform_6, window_bounds = array<i64: 1, 32>}, {transform_indices = @transform_7, window_bounds = array<i64: 16, 32>}]} {
    %c0 = arith.constant 0 : index
    %c0_0 = arith.constant 0 : index
    %0 = vector.load %arg1[%c0, %c0_0] : memref<16x105xbf16, #tpu.memory_space<vmem>>, vector<16x105xbf16>
    %c0_1 = arith.constant 0 : index
    %c0_2 = arith.constant 0 : index
    %1 = vector.load %arg3[%c0_1, %c0_2] : memref<96x96xbf16, #tpu.memory_space<vmem>>, vector<96x96xbf16>
    %c0_3 = arith.constant 0 : index
    %c0_4 = arith.constant 0 : index
    %c0_5 = arith.constant 0 : index
    %2 = vector.load %arg2[%c0_3, %c0_4, %c0_5] : memref<7x105x96xbf16, #tpu.memory_space<vmem>>, vector<1x105x96xbf16>
    %3 = vector.shape_cast %2 : vector<1x105x96xbf16> to vector<105x96xbf16>
    %cst = arith.constant dense<0.000000e+00> : vector<16x96xf32>
    %4 = tpu.matmul %0, %3, %cst {dimension_numbers = #tpu.dot_dimension_numbers<[1], [0], [0], [1], [0, 0, 1, 1], [], []>} : vector<16x105xbf16>, vector<105x96xbf16>, vector<16x96xf32> -> vector<16x96xf32>
    %c1 = arith.constant 1 : index
    %c0_6 = arith.constant 0 : index
    %c0_7 = arith.constant 0 : index
    %5 = vector.load %arg2[%c1, %c0_6, %c0_7] : memref<7x105x96xbf16, #tpu.memory_space<vmem>>, vector<1x105x96xbf16>
    %6 = vector.shape_cast %5 : vector<1x105x96xbf16> to vector<105x96xbf16>
    %cst_8 = arith.constant dense<0.000000e+00> : vector<16x96xf32>
    %7 = tpu.matmul %0, %6, %cst_8 {dimension_numbers = #tpu.dot_dimension_numbers<[1], [0], [0], [1], [0, 0, 1, 1], [], []>} : vector<16x105xbf16>, vector<105x96xbf16>, vector<16x96xf32> -> vector<16x96xf32>
    %8 = arith.mulf %4, %7 : vector<16x96xf32>
    %9 = arith.truncf %8 : vector<16x96xf32> to vector<16x96xbf16>
    %cst_9 = arith.constant dense<0.000000e+00> : vector<16x96xf32>
    %10 = tpu.matmul %9, %1, %cst_9 {dimension_numbers = #tpu.dot_dimension_numbers<[1], [0], [0], [1], [0, 0, 1, 1], [], []>} : vector<16x96xbf16>, vector<96x96xbf16>, vector<16x96xf32> -> vector<16x96xf32>
    %c2 = arith.constant 2 : index
    %c0_10 = arith.constant 0 : index
    %c0_11 = arith.constant 0 : index
    %11 = vector.load %arg2[%c2, %c0_10, %c0_11] : memref<7x105x96xbf16, #tpu.memory_space<vmem>>, vector<1x105x96xbf16>
    %12 = vector.shape_cast %11 : vector<1x105x96xbf16> to vector<105x96xbf16>
    %cst_12 = arith.constant dense<0.000000e+00> : vector<16x96xf32>
    %13 = tpu.matmul %0, %12, %cst_12 {dimension_numbers = #tpu.dot_dimension_numbers<[1], [0], [0], [1], [0, 0, 1, 1], [], []>} : vector<16x105xbf16>, vector<105x96xbf16>, vector<16x96xf32> -> vector<16x96xf32>
    %14 = arith.mulf %4, %13 : vector<16x96xf32>
    %15 = arith.truncf %14 : vector<16x96xf32> to vector<16x96xbf16>
    %cst_13 = arith.constant dense<0.000000e+00> : vector<16x96xf32>
    %16 = tpu.matmul %15, %1, %cst_13 {dimension_numbers = #tpu.dot_dimension_numbers<[1], [0], [0], [1], [0, 0, 1, 1], [], []>} : vector<16x96xbf16>, vector<96x96xbf16>, vector<16x96xf32> -> vector<16x96xf32>
    %c3 = arith.constant 3 : index
    %c0_14 = arith.constant 0 : index
    %c0_15 = arith.constant 0 : index
    %17 = vector.load %arg2[%c3, %c0_14, %c0_15] : memref<7x105x96xbf16, #tpu.memory_space<vmem>>, vector<1x105x96xbf16>
    %18 = vector.shape_cast %17 : vector<1x105x96xbf16> to vector<105x96xbf16>
    %cst_16 = arith.constant dense<0.000000e+00> : vector<16x96xf32>
    %19 = tpu.matmul %0, %18, %cst_16 {dimension_numbers = #tpu.dot_dimension_numbers<[1], [0], [0], [1], [0, 0, 1, 1], [], []>} : vector<16x105xbf16>, vector<105x96xbf16>, vector<16x96xf32> -> vector<16x96xf32>
    %20 = arith.mulf %4, %19 : vector<16x96xf32>
    %21 = arith.truncf %20 : vector<16x96xf32> to vector<16x96xbf16>
    %cst_17 = arith.constant dense<0.000000e+00> : vector<16x96xf32>
    %22 = tpu.matmul %21, %1, %cst_17 {dimension_numbers = #tpu.dot_dimension_numbers<[1], [0], [0], [1], [0, 0, 1, 1], [], []>} : vector<16x96xbf16>, vector<96x96xbf16>, vector<16x96xf32> -> vector<16x96xf32>
    %23 = arith.maximumf %10, %16 : vector<16x96xf32>
    %24 = arith.maximumf %23, %22 : vector<16x96xf32>
    %25 = arith.subf %10, %24 : vector<16x96xf32>
    %26 = math.exp %25 : vector<16x96xf32>
    %27 = arith.subf %16, %24 : vector<16x96xf32>
    %28 = math.exp %27 : vector<16x96xf32>
    %29 = arith.subf %22, %24 : vector<16x96xf32>
    %30 = math.exp %29 : vector<16x96xf32>
    %31 = arith.addf %26, %28 : vector<16x96xf32>
    %32 = arith.addf %31, %30 : vector<16x96xf32>
    %33 = tpu.reciprocal %32 : vector<16x96xf32> -> vector<16x96xf32>
    %c4 = arith.constant 4 : index
    %c0_18 = arith.constant 0 : index
    %c0_19 = arith.constant 0 : index
    %34 = vector.load %arg2[%c4, %c0_18, %c0_19] : memref<7x105x96xbf16, #tpu.memory_space<vmem>>, vector<1x105x96xbf16>
    %35 = vector.shape_cast %34 : vector<1x105x96xbf16> to vector<105x96xbf16>
    %cst_20 = arith.constant dense<0.000000e+00> : vector<16x96xf32>
    %36 = tpu.matmul %0, %35, %cst_20 {dimension_numbers = #tpu.dot_dimension_numbers<[1], [0], [0], [1], [0, 0, 1, 1], [], []>} : vector<16x105xbf16>, vector<105x96xbf16>, vector<16x96xf32> -> vector<16x96xf32>
    %37 = arith.mulf %26, %36 : vector<16x96xf32>
    %c5 = arith.constant 5 : index
    %c0_21 = arith.constant 0 : index
    %c0_22 = arith.constant 0 : index
    %38 = vector.load %arg2[%c5, %c0_21, %c0_22] : memref<7x105x96xbf16, #tpu.memory_space<vmem>>, vector<1x105x96xbf16>
    %39 = vector.shape_cast %38 : vector<1x105x96xbf16> to vector<105x96xbf16>
    %cst_23 = arith.constant dense<0.000000e+00> : vector<16x96xf32>
    %40 = tpu.matmul %0, %39, %cst_23 {dimension_numbers = #tpu.dot_dimension_numbers<[1], [0], [0], [1], [0, 0, 1, 1], [], []>} : vector<16x105xbf16>, vector<105x96xbf16>, vector<16x96xf32> -> vector<16x96xf32>
    %41 = arith.mulf %28, %40 : vector<16x96xf32>
    %42 = arith.addf %37, %41 : vector<16x96xf32>
    %c6 = arith.constant 6 : index
    %c0_24 = arith.constant 0 : index
    %c0_25 = arith.constant 0 : index
    %43 = vector.load %arg2[%c6, %c0_24, %c0_25] : memref<7x105x96xbf16, #tpu.memory_space<vmem>>, vector<1x105x96xbf16>
    %44 = vector.shape_cast %43 : vector<1x105x96xbf16> to vector<105x96xbf16>
    %cst_26 = arith.constant dense<0.000000e+00> : vector<16x96xf32>
    %45 = tpu.matmul %0, %44, %cst_26 {dimension_numbers = #tpu.dot_dimension_numbers<[1], [0], [0], [1], [0, 0, 1, 1], [], []>} : vector<16x105xbf16>, vector<105x96xbf16>, vector<16x96xf32> -> vector<16x96xf32>
    %46 = arith.mulf %30, %45 : vector<16x96xf32>
    %47 = arith.addf %42, %46 : vector<16x96xf32>
    %48 = arith.mulf %47, %33 : vector<16x96xf32>
    %49 = arith.truncf %48 : vector<16x96xf32> to vector<16x96xbf16>
    %c0_27 = arith.constant 0 : index
    %c0_28 = arith.constant 0 : index
    %50 = vector.load %arg4[%c0_27, %c0_28] : memref<96x32xbf16, #tpu.memory_space<vmem>>, vector<96x32xbf16>
    %cst_29 = arith.constant dense<0.000000e+00> : vector<16x32xf32>
    %51 = tpu.matmul %49, %50, %cst_29 {dimension_numbers = #tpu.dot_dimension_numbers<[1], [0], [0], [1], [0, 0, 1, 1], [], []>} : vector<16x96xbf16>, vector<96x32xbf16>, vector<16x32xf32> -> vector<16x32xf32>
    %c0_30 = arith.constant 0 : index
    %c0_31 = arith.constant 0 : index
    %52 = vector.load %arg5[%c0_30, %c0_31] : memref<1x32xf32, #tpu.memory_space<vmem>>, vector<1x32xf32>
    %53 = vector.broadcast %52 : vector<1x32xf32> to vector<16x32xf32>
    %54 = arith.addf %51, %53 : vector<16x32xf32>
    %cst_32 = arith.constant dense<0.000000e+00> : vector<16xf32>
    %55 = vector.multi_reduction <add>, %54, %cst_32 [1] : vector<16x32xf32> to vector<16xf32>
    %56 = vector.shape_cast %55 : vector<16xf32> to vector<16x1xf32>
    %cst_33 = arith.constant 3.200000e+01 : f32
    %57 = vector.broadcast %cst_33 : f32 to vector<16x1xf32>
    %58 = arith.divf %56, %57 : vector<16x1xf32>
    %59 = vector.broadcast %58 : vector<16x1xf32> to vector<16x32xf32>
    %60 = arith.subf %54, %59 : vector<16x32xf32>
    %61 = arith.mulf %60, %60 : vector<16x32xf32>
    %cst_34 = arith.constant dense<0.000000e+00> : vector<16xf32>
    %62 = vector.multi_reduction <add>, %61, %cst_34 [1] : vector<16x32xf32> to vector<16xf32>
    %63 = vector.shape_cast %62 : vector<16xf32> to vector<16x1xf32>
    %cst_35 = arith.constant 3.200000e+01 : f32
    %64 = vector.broadcast %cst_35 : f32 to vector<16x1xf32>
    %65 = arith.divf %63, %64 : vector<16x1xf32>
    %66 = vector.broadcast %58 : vector<16x1xf32> to vector<16x32xf32>
    %67 = arith.subf %54, %66 : vector<16x32xf32>
    %cst_36 = arith.constant 9.99999974E-6 : f32
    %68 = vector.broadcast %cst_36 : f32 to vector<16x1xf32>
    %69 = arith.addf %65, %68 : vector<16x1xf32>
    %70 = math.rsqrt %69 : vector<16x1xf32>
    %71 = vector.broadcast %70 : vector<16x1xf32> to vector<16x32xf32>
    %72 = arith.mulf %67, %71 : vector<16x32xf32>
    %c0_37 = arith.constant 0 : index
    %c0_38 = arith.constant 0 : index
    %73 = vector.load %arg6[%c0_37, %c0_38] : memref<1x32xf32, #tpu.memory_space<vmem>>, vector<1x32xf32>
    %74 = vector.broadcast %73 : vector<1x32xf32> to vector<16x32xf32>
    %75 = arith.mulf %72, %74 : vector<16x32xf32>
    %c0_39 = arith.constant 0 : index
    %c0_40 = arith.constant 0 : index
    %76 = vector.load %arg7[%c0_39, %c0_40] : memref<1x32xf32, #tpu.memory_space<vmem>>, vector<1x32xf32>
    %77 = vector.broadcast %76 : vector<1x32xf32> to vector<16x32xf32>
    %78 = arith.addf %75, %77 : vector<16x32xf32>
    %c0_41 = arith.constant 0 : index
    %c0_42 = arith.constant 0 : index
    %79 = vector.load %arg8[%c0_41, %c0_42] : memref<16x32xf32, #tpu.memory_space<vmem>>, vector<16x32xf32>
    tpu.vector_store %arg8[%c0_41, %c0_42], %78 {strides = array<i32>} : memref<16x32xf32, #tpu.memory_space<vmem>>, vector<16x32xf32>,
    return
  }
  func.func @transform_0(%arg0: i32) -> (i32, i32) {
    %c0_i32 = arith.constant 0 : i32
    %c0_i32_0 = arith.constant 0 : i32
    return %arg0, %c0_i32 : i32, i32
  }
  func.func @transform_1(%arg0: i32) -> (i32, i32, i32) {
    %c0_i32 = arith.constant 0 : i32
    %c0_i32_0 = arith.constant 0 : i32
    %c0_i32_1 = arith.constant 0 : i32
    %c0_i32_2 = arith.constant 0 : i32
    return %c0_i32, %c0_i32_0, %c0_i32_1 : i32, i32, i32
  }
  func.func @transform_2(%arg0: i32) -> (i32, i32) {
    %c0_i32 = arith.constant 0 : i32
    %c0_i32_0 = arith.constant 0 : i32
    %c0_i32_1 = arith.constant 0 : i32
    return %c0_i32, %c0_i32_0 : i32, i32
  }
  func.func @transform_3(%arg0: i32) -> (i32, i32) {
    %c0_i32 = arith.constant 0 : i32
    %c0_i32_0 = arith.constant 0 : i32
    %c0_i32_1 = arith.constant 0 : i32
    return %c0_i32, %c0_i32_0 : i32, i32
  }
  func.func @transform_4(%arg0: i32) -> (i32, i32) {
    %c0_i32 = arith.constant 0 : i32
    %c0_i32_0 = arith.constant 0 : i32
    %c0_i32_1 = arith.constant 0 : i32
    return %c0_i32, %c0_i32_0 : i32, i32
  }
  func.func @transform_5(%arg0: i32) -> (i32, i32) {
    %c0_i32 = arith.constant 0 : i32
    %c0_i32_0 = arith.constant 0 : i32
    %c0_i32_1 = arith.constant 0 : i32
    return %c0_i32, %c0_i32_0 : i32, i32
  }
  func.func @transform_6(%arg0: i32) -> (i32, i32) {
    %c0_i32 = arith.constant 0 : i32
    %c0_i32_0 = arith.constant 0 : i32
    %c0_i32_1 = arith.constant 0 : i32
    return %c0_i32, %c0_i32_0 : i32, i32
  }
  func.func @transform_7(%arg0: i32) -> (i32, i32) {
    %c0_i32 = arith.constant 0 : i32
    %c0_i32_0 = arith.constant 0 : i32
    return %arg0, %c0_i32 : i32, i32
  }
}

</mosaic_0001>

<bundles_post_ra>
// kernel: tpu_custom_call.1
= control target key start
LH: loop header
LB: loop body
LE: loop exit
PB: predicated region body
PF: predicated region fallthrough
CT: control target
= control target key end

     0   :  { %s2020_s24 = smov 0   ;;  %s2399_s0 = inlined_call_operand.vmem [shape: bf16[64,105], index: 0, kind: input, shape index: {}]   ;;  %s2400_s1 = inlined_call_operand.vmem [shape: bf16[7,105,96], index: 1, kind: input, shape index: {}]   ;;  %s2401_s2 = inlined_call_operand.vmem [shape: bf16[96,96], index: 2, kind: input, shape index: {}]   ;;  %s2402_s3 = inlined_call_operand.vmem [shape: bf16[96,32], index: 3, kind: input, shape index: {}]   ;;  %s2403_s4 = inlined_call_operand.vmem [shape: f32[1,32], index: 4, kind: input, shape index: {}]   ;;  %s2404_s5 = inlined_call_operand.vmem [shape: f32[1,32], index: 5, kind: input, shape index: {}]   ;;  %s2405_s6 = inlined_call_operand.vmem [shape: f32[1,32], index: 6, kind: input, shape index: {}]   ;;  %s2406_s7 = inlined_call_operand.vmem [shape: f32[64,32], index: 7, kind: output, shape index: {}]  }
   0x1 LB: > { %s1431_s25 = sadd.s32 4294967295, %s1975_s24   ;;  %p1435_p0 = scmp.ge.s32.totalorder %s1975_s24, 1  ;;  %s1975_s24 = sphi %s2020_s24, %s17_s24  }
   0x2   : > { %p238_p1 = scmp.lt.s32.totalorder %s1975_s24, 5 }
   0x4   : > { %p239_p2 = pnand %p1435_p0, %p238_p1 }
   0x5   : > { %v1887_v0 = vld [vmem:[%s2400_s1] sm:$0xff] (!%p239_p2)   ;;  %v1977_v1 = vmov (!%p239_p2), 0.0   ;;  %v1888_v2 = vld [vmem:[%s2400_s1 + $0x38] sm:$0xff] (!%p239_p2)   ;;  %v1889_v3 = vld [vmem:[%s2400_s1 + $0x8] sm:$0xff] (!%p239_p2)   ;;  %s1436_s15 = sshll.u32 (!%p239_p2), %s1431_s25, 1  ;;  %vm1978_vm0 = vmmov (!%p239_p2), 0  }
   0x6   : > { %242 = sbr.rel (%p239_p2) target bundleno = 1092 (0x444), region = 48  ;;  %1686 = vmatprep.subr.bf16.mxu0 (!%p239_p2), %v1977_v1  ;;  %1704 = vmatprep.subr.bf16.mxu1 (!%p239_p2), %v1977_v1  ;;  %v1890_v4 = vld [vmem:[%s2400_s1 + $0x40] sm:$0xff] (!%p239_p2)   ;;  %v1891_v5 = vld [vmem:[%s2400_s1 + $0x10] sm:$0xff] (!%p239_p2)   ;;  %v1892_v6 = vld [vmem:[%s2400_s1 + $0x48] sm:$0xff] (!%p239_p2)   ;;  %p271_p3 = scmp.lt.s32.totalorder (!%p239_p2), %s1436_s15, 7  ;;  %vm361_vm1 = vcmask (!%p239_p2), 1043456  }
   0x7   : > { %1687 = vmatpush3.bf16.msra.mxu0 (!%p239_p2), %v1887_v0  ;;  %1705 = vmatpush3.bf16.msra.mxu1 (!%p239_p2), %v1888_v2  ;;  %v1893_v7 = vld [vmem:[%s2400_s1 + $0x18] sm:$0xff] (!%p239_p2)   ;;  %v1894_v8 = vld [vmem:[%s2400_s1 + $0x50] sm:$0xff] (!%p239_p2)   ;;  %vm362_vm2 = vcmask (!%p239_p2), 1044480   ;;  %v1979_v9 = vmov (!%p239_p2), 65535   ;;  %v1895_v11 = vld [vmem:[%s2400_s1 + $0x20] sm:$0xff] (!%p239_p2)   ;;  %vm357_vm3 = vcmask (!%p239_p2), 859136  }
   0x8   : > { %1688 = vmatprep.subr.bf16.mxu0 (!%p239_p2), %v1977_v1  ;;  %1706 = vmatprep.subr.bf16.mxu1 (!%p239_p2), %v1977_v1  ;;  %v363_v10 = vsel (!%p239_p2), %vm361_vm1, 4294967295, %v1979_v9  ;;  %v1896_v12 = vld [vmem:[%s2400_s1 + $0x58] sm:$0xff] (!%p239_p2)   ;;  %v1897_v13 = vld [vmem:[%s2400_s1 + $0x28] sm:$0xff] (!%p239_p2)   ;;  %v1898_v14 = vld [vmem:[%s2400_s1 + $0x60] sm:$0xff] (!%p239_p2)   ;;  %vm548_vm4 = vcmask (!%p239_p2), 785408   ;;  %vm1327_vm5 = vcmask (!%p239_p2), 261120  }
   0x9   : > { %1700 = vmatprep.mubr.msk.bf16.mxu0 (!%p239_p2), %vm1978_vm0, %v1977_v1  ;;  %1718 = vmatprep.mubr.msk.bf16.mxu1 (!%p239_p2), %vm1978_vm0, %v1977_v1  ;;  %v2084_v15 = vsel (!%p239_p2), %vm362_vm2, %v363_v10, 0  ;;  %v1899_v16 = vld [vmem:[%s2400_s1 + $0x30] sm:$0x1f] (!%p239_p2)   ;;  %v1900_v17 = vld [vmem:[%s2400_s1 + $0x68] sm:$0x1f] (!%p239_p2)   ;;  %v2110_v22 = vld [vmem:[%s2401_s2] sm:$0xff] (!%p239_p2)  }
   0xa   : > { %v366_v18 = vand.u32 (!%p239_p2), %v1899_v16, %v2084_v15  ;;  %v466_v19 = vand.u32 (!%p239_p2), %v1900_v17, %v2084_v15  ;;  %v1902_v21 = vld [vmem:[%s2400_s1 + $0x70] sm:$0xff] (!%p239_p2)   ;;  %v1903_v23 = vld [vmem:[%s2400_s1 + $0x78] sm:$0xff] (!%p239_p2)   ;;  %v2126_v24 = vld [vmem:[%s2401_s2 + $0x8] sm:$0xff] (!%p239_p2)  }
   0xb   : > { %1689 = vmatpush3.bf16.msra.mxu0 (!%p239_p2), %v1889_v3  ;;  %1707 = vmatpush3.bf16.msra.mxu1 (!%p239_p2), %v1890_v4  ;;  %v1904_v25 = vld [vmem:[%s2400_s1 + $0x80] sm:$0xff] (!%p239_p2)   ;;  %v2135_v26 = vld [vmem:[%s2401_s2 + $0x10] sm:$0xff] (!%p239_p2)   ;;  %v1905_v27 = vld [vmem:[%s2400_s1 + $0x88] sm:$0xff] (!%p239_p2)  }
   0xc   : > { %1690 = vmatprep.subr.bf16.mxu0 (!%p239_p2), %v1977_v1  ;;  %1708 = vmatprep.subr.bf16.mxu1 (!%p239_p2), %v1977_v1  ;;  %v2146_v28 = vld [vmem:[%s2401_s2 + $0x18] sm:$0xff] (!%p239_p2)   ;;  %v1906_v29 = vld [vmem:[%s2400_s1 + $0x90] sm:$0xff] (!%p239_p2)   ;;  %v1908_v31 = vld [vmem:[%s2400_s1 + $0xa0] sm:$0x1f] (!%p239_p2)  }
   0xd   : > { %s2408_s15 = smov (!%p271_p3, %s1436_s15), 7  ;;  %v1907_v30 = vld [vmem:[%s2400_s1 + $0x98] sm:$0xff]   ;;  %v650_v32 = vand.u32 %v1908_v31, %v2084_v15  ;;  %v1909_v33 = vld [vmem:[%s2400_s1 + $0xa8] sm:$0xff]   ;;  %v1910_v34 = vld [vmem:[%s2400_s1 + $0xb0] sm:$0xff]  }
   0xe   : > { %s1437_s22 = sshll.u32 %s2408_s15, 2  ;;  %v1911_v35 = vld [vmem:[%s2400_s1 + $0xb8] sm:$0xff]   ;;  %v1912_v36 = vld [vmem:[%s2400_s1 + $0xc0] sm:$0xff]   ;;  %v1913_v37 = vld [vmem:[%s2400_s1 + $0xc8] sm:$0xff]   ;;  %s1439_s30 = sshll.u32 %s2408_s15, 3 }
   0xf   : > { %1691 = vmatpush3.bf16.msra.mxu0 %v1891_v5  ;;  %1709 = vmatpush3.bf16.msra.mxu1 %v1892_v6  ;;  %s274_s28 = scalar_lea.vmem %s2399_s0, %s1437_s22  ;;  %v1914_v38 = vld [vmem:[%s2400_s1 + $0xd0] sm:$0xff]   ;;  %v1915_v39 = vld [vmem:[%s2400_s1 + $0xd8] sm:$0x1f]   ;;  %v2207_v41 = vld [vmem:[%s2401_s2 + $0x20] sm:$0xff]   ;;  %s280_s12 = scalar_lea.vmem %s2406_s7, %s1439_s30 }
  0x10   : > { %1692 = vmatprep.subr.bf16.mxu0 %v1977_v1  ;;  %1710 = vmatprep.subr.bf16.mxu1 %v1977_v1  ;;  %v2098_v20 = vld [vmem:[%s274_s28] sm:$0xff]   ;;  %v797_v40 = vand.u32 %v1915_v39, %v2084_v15  ;;  %v2214_v42 = vld [vmem:[%s2401_s2 + $0x28] sm:$0xff]   ;;  %v1924_v45 = vld [vmem:[%s2400_s1 + $0xf0] sm:$0xff]  }
  0x11   : > { %v1922_v43 = vld [vmem:[%s2400_s1 + $0xe0] sm:$0xff]   ;;  %v1923_v44 = vld [vmem:[%s2400_s1 + $0xe8] sm:$0xff]   ;;  %v1925_v46 = vld [vmem:[%s2400_s1 + $0xf8] sm:$0xff]  }
  0x12   : > { %v1926_v47 = vld [vmem:[%s2400_s1 + $0x100] sm:$0xff]   ;;  %v1927_v48 = vld [vmem:[%s2400_s1 + $0x108] sm:$0xff]   ;;  %v1928_v49 = vld [vmem:[%s2400_s1 + $0x110] sm:$0x1f]  }
  0x13   : > { %1693 = vmatpush3.bf16.msra.mxu0 %v1893_v7  ;;  %1711 = vmatpush3.bf16.msra.mxu1 %v1894_v8  ;;  %v972_v50 = vand.u32 %v1928_v49, %v2084_v15  ;;  %v1929_v51 = vld [vmem:[%s2400_s1 + $0x150] sm:$0xff]   ;;  %v1930_v52 = vld [vmem:[%s2400_s1 + $0x158] sm:$0xff]   ;;  %v1931_v53 = vld [vmem:[%s2400_s1 + $0x160] sm:$0xff]  }
  0x14   : > { %1694 = vmatprep.subr.bf16.mxu0 %v1977_v1  ;;  %1712 = vmatprep.subr.bf16.mxu1 %v1977_v1  ;;  %v1933_v54 = vld [vmem:[%s2400_s1 + $0x168] sm:$0xff]   ;;  %v1935_v55 = vld [vmem:[%s2400_s1 + $0x170] sm:$0xff]   ;;  %v1937_v56 = vld [vmem:[%s2400_s1 + $0x178] sm:$0xff]  }
  0x15   : > { %v1939_v57 = vld [vmem:[%s2400_s1 + $0x180] sm:$0x1f]   ;;  %v1945_v39 = vld [vmem:[%s2402_s3 + $0x10] sm:$0xff]  }
  0x16   : > { %v1178_v58 = vand.u32 %v1939_v57, %v2084_v15 }
  0x17   : > { %1695 = vmatpush3.bf16.msra.mxu0 %v1895_v11  ;;  %1713 = vmatpush3.bf16.msra.mxu1 %v1896_v12 }
  0x18   : > { %1696 = vmatprep.subr.bf16.mxu0 %v1977_v1  ;;  %1714 = vmatprep.subr.bf16.mxu1 %v1977_v1 }
  0x1b   : > { %1697 = vmatpush3.bf16.msra.mxu0 %v1897_v13  ;;  %1715 = vmatpush3.bf16.msra.mxu1 %v1898_v14 }
  0x1c   : > { %1698 = vmatprep.subr.bf16.mxu0 %v1977_v1  ;;  %1716 = vmatprep.subr.bf16.mxu1 %v1977_v1 }
  0x1f   : > { %1699 = vmatpush3.bf16.msra.mxu0 %v366_v18  ;;  %1717 = vmatpush3.bf16.msra.mxu1 %v466_v19 }
  0x20   : > { %1722 = vmatprep.subr.bf16.mxu0 %v1977_v1  ;;  %1738 = vmatprep.subr.bf16.mxu1 %v1977_v1 }
  0x22   : > { %1701 = vmatmul.mubr.msk.bf16.vlgmr.msra.gmra.mrb[0].mxu0 %vm357_vm3, %v2098_v20  ;;  %1719 = vmatmul.mubr.msk.bf16.vlgmr.msra.gmra.mrb[0].mxu1 %vm357_vm3, %v2098_v20 }
  0x23   : > { %1734 = vmatprep.mubr.msk.bf16.mxu0 %vm1978_vm0, %v1977_v1  ;;  %1739 = vmatpush3.bf16.msra.mxu1 %v1902_v21 }
  0x24   : > { %1752 = vmatprep.mubr.msk.bf16.mxu1 %vm1978_vm0, %v1977_v1  ;;  %1740 = vmatprep.subr.bf16.mxu1 %v1977_v1 }
  0x25   : > { %1723 = vmatpush3.bf16.msra.mxu0 %v2110_v22 }
  0x26   : > { %1724 = vmatprep.subr.bf16.mxu0 %v1977_v1 }
  0x27   : > { %1741 = vmatpush3.bf16.msra.mxu1 %v1903_v23 }
  0x28   : > { %1742 = vmatprep.subr.bf16.mxu1 %v1977_v1 }
  0x29   : > { %1725 = vmatpush3.bf16.msra.mxu0 %v2126_v24 }
  0x2a   : > { %1726 = vmatprep.subr.bf16.mxu0 %v1977_v1 }
  0x2b   : > { %1743 = vmatpush3.bf16.msra.mxu1 %v1904_v25  ;;  %v1936_v25 = vld [vmem:[%s2400_s1 + $0x128] sm:$0xff]  }
  0x2c   : > { %1744 = vmatprep.subr.bf16.mxu1 %v1977_v1 }
  0x2d   : > { %1727 = vmatpush3.bf16.msra.mxu0 %v2135_v26 }
  0x2e   : > { %1728 = vmatprep.subr.bf16.mxu0 %v1977_v1 }
  0x2f   : > { %1745 = vmatpush3.bf16.msra.mxu1 %v1905_v27  ;;  %v1940_v27 = vld [vmem:[%s2400_s1 + $0x138] sm:$0xff]  }
  0x30   : > { %1746 = vmatprep.subr.bf16.mxu1 %v1977_v1 }
  0x31   : > { %1729 = vmatpush3.bf16.msra.mxu0 %v2146_v28 }
  0x32   : > { %1730 = vmatprep.subr.bf16.mxu0 %v1977_v1 }
  0x33   : > { %1747 = vmatpush3.bf16.msra.mxu1 %v1906_v29  ;;  %v1942_v29 = vld [vmem:[%s2400_s1 + $0x148] sm:$0x1f]  }
  0x34   : > { %1748 = vmatprep.subr.bf16.mxu1 %v1977_v1 }
  0x35   : > { %1731 = vmatpush3.bf16.msra.mxu0 %v2207_v41 }
  0x36   : > { %1732 = vmatprep.subr.bf16.mxu0 %v1977_v1 }
  0x37   : > { %1749 = vmatpush3.bf16.msra.mxu1 %v1907_v30  ;;  %v1074_v30 = vand.u32 %v1942_v29, %v2084_v15  ;;  %v1943_v15 = vld [vmem:[%s2402_s3] sm:$0xff]  }
  0x38   : > { %1750 = vmatprep.subr.bf16.mxu1 %v1977_v1 }
  0x39   : > { %1733 = vmatpush3.bf16.msra.mxu0 %v2214_v42 }
  0x3a   : > { %1756 = vmatprep.subr.bf16.mxu0 %v1977_v1 }
  0x3b   : > { %1751 = vmatpush3.bf16.msra.mxu1 %v650_v32 }
  0x3c   : > { %1772 = vmatprep.subr.bf16.mxu1 %v1977_v1 }
  0x3e   : > { %1753 = vmatmul.mubr.msk.bf16.vlgmr.msra.gmra.mrb[4].mxu1 %vm357_vm3, %v2098_v20 }
  0x3f   : > { %1773 = vmatpush3.bf16.msra.mxu1 %v1909_v33  ;;  %1786 = vmatprep.mubr.msk.bf16.mxu1 %vm1978_vm0, %v1977_v1 }
  0x40   : > { %1774 = vmatprep.subr.bf16.mxu1 %v1977_v1 }
  0x43   : > { %1775 = vmatpush3.bf16.msra.mxu1 %v1910_v34 }
  0x44   : > { %1776 = vmatprep.subr.bf16.mxu1 %v1977_v1 }
  0x47   : > { %1777 = vmatpush3.bf16.msra.mxu1 %v1911_v35 }
  0x48   : > { %1778 = vmatprep.subr.bf16.mxu1 %v1977_v1 }
  0x4b   : > { %1779 = vmatpush3.bf16.msra.mxu1 %v1912_v36 }
  0x4c   : > { %1780 = vmatprep.subr.bf16.mxu1 %v1977_v1 }
  0x4f   : > { %1781 = vmatpush3.bf16.msra.mxu1 %v1913_v37 }
  0x50   : > { %1782 = vmatprep.subr.bf16.mxu1 %v1977_v1 }
  0x53   : > { %1783 = vmatpush3.bf16.msra.mxu1 %v1914_v38 }
  0x54   : > { %1784 = vmatprep.subr.bf16.mxu1 %v1977_v1 }
  0x57   : > { %1785 = vmatpush3.bf16.msra.mxu1 %v797_v40  ;;  %v1946_v40 = vld [vmem:[%s2402_s3 + $0x18] sm:$0xff]  }
  0x58   : > { %1806 = vmatprep.subr.bf16.mxu1 %v1977_v1 }
  0x5a   : > { %1787 = vmatmul.mubr.msk.bf16.vlgmr.msra.gmra.mrb[8].mxu1 %vm357_vm3, %v2098_v20 }
  0x5b   : > { %1820 = vmatprep.mubr.msk.bf16.mxu1 %vm1978_vm0, %v1977_v1  ;;  %1807 = vmatpush3.bf16.msra.mxu1 %v1922_v43 }
  0x5c   : > { %1808 = vmatprep.subr.bf16.mxu1 %v1977_v1 }
  0x5f   : > { %1809 = vmatpush3.bf16.msra.mxu1 %v1923_v44 }
  0x60   : > { %1810 = vmatprep.subr.bf16.mxu1 %v1977_v1 }
  0x63   : > { %1811 = vmatpush3.bf16.msra.mxu1 %v1924_v45 }
  0x64   : > { %1812 = vmatprep.subr.bf16.mxu1 %v1977_v1 }
  0x67   : > { %1813 = vmatpush3.bf16.msra.mxu1 %v1925_v46 }
  0x68   : > { %1814 = vmatprep.subr.bf16.mxu1 %v1977_v1 }
  0x6b   : > { %1815 = vmatpush3.bf16.msra.mxu1 %v1926_v47 }
  0x6c   : > { %1816 = vmatprep.subr.bf16.mxu1 %v1977_v1 }
  0x6f   : > { %1817 = vmatpush3.bf16.msra.mxu1 %v1927_v48 }
  0x70   : > { %1818 = vmatprep.subr.bf16.mxu1 %v1977_v1 }
  0x73   : > { %1819 = vmatpush3.bf16.msra.mxu1 %v972_v50 }
  0x74   : > { %1842 = vmatprep.subr.bf16.mxu1 %v1977_v1 }
  0x76   : > { %1821 = vmatmul.mubr.msk.bf16.vlgmr.msra.gmra.mrb[12].mxu1 %vm357_vm3, %v2098_v20 }
  0x77   : > { %1843 = vmatpush3.bf16.msra.mxu1 %v1929_v51  ;;  %1856 = vmatprep.mubr.msk.bf16.mxu1 %vm1978_vm0, %v1977_v1 }
  0x78   : > { %1844 = vmatprep.subr.bf16.mxu1 %v1977_v1 }
  0x7b   : > { %1845 = vmatpush3.bf16.msra.mxu1 %v1930_v52 }
  0x7c   : > { %1846 = vmatprep.subr.bf16.mxu1 %v1977_v1 }
  0x7f   : > { %1847 = vmatpush3.bf16.msra.mxu1 %v1931_v53 }
  0x80   : > { %1848 = vmatprep.subr.bf16.mxu1 %v1977_v1 }
  0x83   : > { %1849 = vmatpush3.bf16.msra.mxu1 %v1933_v54 }
  0x84   : > { %1850 = vmatprep.subr.bf16.mxu1 %v1977_v1 }
  0x87   : > { %1851 = vmatpush3.bf16.msra.mxu1 %v1935_v55 }
  0x88   : > { %1852 = vmatprep.subr.bf16.mxu1 %v1977_v1 }
  0x8b   : > { %1853 = vmatpush3.bf16.msra.mxu1 %v1937_v56 }
  0x8c   : > { %1854 = vmatprep.subr.bf16.mxu1 %v1977_v1 }
  0x8f   : > { %1855 = vmatpush3.bf16.msra.mxu1 %v1178_v58 }
  0x92   : > { %1857 = vmatmul.mubr.msk.bf16.vlgmr.msra.gmra.mrb[16].mxu1 %vm357_vm3, %v2098_v20 }
  0xf5   : > { %v402_v59 = vpop.f32.mrb[0].mxu0  ;;  %v502_v60 = vpop.f32.mrb[0].mxu1 }
  0xf6   : > { %v1702_v61 = vpop.f32.mrb[1].mxu0  ;;  %v509_v62 = vmul.f32 %v502_v60, %v402_v59  ;;  %v1720_v63 = vpop.f32.mrb[1].mxu1 }
  0xf7   : > { %v405_v0 = vpop.f32.mrb[2].mxu0  ;;  %v505_v2 = vpop.f32.mrb[2].mxu1 }
  0xf8   : > { %v1703_v3 = vpop.f32.mrb[3].mxu0  ;;  %v510_v4 = vmul.f32 %v505_v2, %v405_v0  ;;  %v1721_v5 = vpop.f32.mrb[3].mxu1 }
  0xfa   : > { %v511_v6 = vpack.c.bf16 %v510_v4, %v509_v62 }
  0xfc   : > { %1735 = vmatmul.mubr.msk.bf16.vlgmr.msra.gmra.mrb[4].mxu0 %vm548_vm4, %v511_v6 }
  0xfd   : > { %1757 = vmatpush3.bf16.msra.mxu0 %v2110_v22  ;;  %1768 = vmatprep.mubr.msk.bf16.mxu0 %vm1978_vm0, %v1977_v1 }
  0xfe   : > { %1758 = vmatprep.subr.bf16.mxu0 %v1977_v1 }
 0x101   : > { %1759 = vmatpush3.bf16.msra.mxu0 %v2126_v24 }
 0x102   : > { %1760 = vmatprep.subr.bf16.mxu0 %v1977_v1 }
 0x105   : > { %1761 = vmatpush3.bf16.msra.mxu0 %v2135_v26 }
 0x106   : > { %1762 = vmatprep.subr.bf16.mxu0 %v1977_v1 }
 0x109   : > { %1763 = vmatpush3.bf16.msra.mxu0 %v2146_v28 }
 0x10a   : > { %1764 = vmatprep.subr.bf16.mxu0 %v1977_v1 }
 0x10d   : > { %1765 = vmatpush3.bf16.msra.mxu0 %v2207_v41 }
 0x10e   : > { %1766 = vmatprep.subr.bf16.mxu0 %v1977_v1 }
 0x111   : > { %v686_v7 = vpop.f32.mrb[4].mxu1  ;;  %1767 = vmatpush3.bf16.msra.mxu0 %v2214_v42 }
 0x112   : > { %v693_v8 = vmul.f32 %v686_v7, %v402_v59  ;;  %v1754_v9 = vpop.f32.mrb[5].mxu1  ;;  %1790 = vmatprep.subr.bf16.mxu0 %v1977_v1 }
 0x113   : > { %v689_v10 = vpop.f32.mrb[6].mxu1 }
 0x114   : > { %v694_v11 = vmul.f32 %v689_v10, %v405_v0  ;;  %v1755_v12 = vpop.f32.mrb[7].mxu1 }
 0x116   : > { %v695_v13 = vpack.c.bf16 %v694_v11, %v693_v8 }
 0x118   : > { %1769 = vmatmul.mubr.msk.bf16.vlgmr.msra.gmra.mrb[8].mxu0 %vm548_vm4, %v695_v13 }
 0x119   : > { %1791 = vmatpush3.bf16.msra.mxu0 %v2110_v22  ;;  %1802 = vmatprep.mubr.msk.bf16.mxu0 %vm1978_vm0, %v1977_v1  ;;  %v1932_v22 = vld [vmem:[%s2400_s1 + $0x118] sm:$0xff]  }
 0x11a   : > { %1792 = vmatprep.subr.bf16.mxu0 %v1977_v1 }
 0x11d   : > { %1793 = vmatpush3.bf16.msra.mxu0 %v2126_v24  ;;  %v1934_v24 = vld [vmem:[%s2400_s1 + $0x120] sm:$0xff]  }
 0x11e   : > { %1794 = vmatprep.subr.bf16.mxu0 %v1977_v1 }
 0x121   : > { %1795 = vmatpush3.bf16.msra.mxu0 %v2135_v26  ;;  %v1938_v26 = vld [vmem:[%s2400_s1 + $0x130] sm:$0xff]  }
 0x122   : > { %1796 = vmatprep.subr.bf16.mxu0 %v1977_v1 }
 0x125   : > { %1797 = vmatpush3.bf16.msra.mxu0 %v2146_v28  ;;  %v1941_v28 = vld [vmem:[%s2400_s1 + $0x140] sm:$0xff]  }
 0x126   : > { %1798 = vmatprep.subr.bf16.mxu0 %v1977_v1 }
 0x129   : > { %1799 = vmatpush3.bf16.msra.mxu0 %v2207_v41  ;;  %v1947_v41 = vld [vmem:[%s2402_s3 + $0x20] sm:$0xff]  }
 0x12a   : > { %1800 = vmatprep.subr.bf16.mxu0 %v1977_v1 }
 0x12d   : > { %v833_v14 = vpop.f32.mrb[8].mxu1  ;;  %1801 = vmatpush3.bf16.msra.mxu0 %v2214_v42  ;;  %v1948_v42 = vld [vmem:[%s2402_s3 + $0x28] sm:$0xff]  }
 0x12e   : > { %v840_v16 = vmul.f32 %v833_v14, %v402_v59  ;;  %v1788_v17 = vpop.f32.mrb[9].mxu1  ;;  %1824 = vmatprep.subr.bf16.mxu0 %v1977_v1 }
 0x12f   : > { %v836_v18 = vpop.f32.mrb[10].mxu1 }
 0x130   : > { %v841_v19 = vmul.f32 %v836_v18, %v405_v0  ;;  %v1789_v21 = vpop.f32.mrb[11].mxu1 }
 0x132   : > { %v842_v23 = vpack.c.bf16 %v841_v19, %v840_v16 }
 0x134   : > { %1803 = vmatmul.mubr.msk.bf16.vlgmr.msra.gmra.mrb[12].mxu0 %vm548_vm4, %v842_v23 }
 0x135   : > { %1825 = vmatpush3.bf16.msra.mxu0 %v1932_v22  ;;  %1838 = vmatprep.mubr.msk.bf16.mxu0 %vm1978_vm0, %v1977_v1 }
 0x136   : > { %1826 = vmatprep.subr.bf16.mxu0 %v1977_v1 }
 0x139   : > { %1827 = vmatpush3.bf16.msra.mxu0 %v1934_v24 }
 0x13a   : > { %1828 = vmatprep.subr.bf16.mxu0 %v1977_v1 }
 0x13d   : > { %1829 = vmatpush3.bf16.msra.mxu0 %v1936_v25 }
 0x13e   : > { %1830 = vmatprep.subr.bf16.mxu0 %v1977_v1 }
 0x141   : > { %1831 = vmatpush3.bf16.msra.mxu0 %v1938_v26 }
 0x142   : > { %1832 = vmatprep.subr.bf16.mxu0 %v1977_v1 }
 0x145   : > { %1833 = vmatpush3.bf16.msra.mxu0 %v1940_v27 }
 0x146   : > { %1834 = vmatprep.subr.bf16.mxu0 %v1977_v1 }
 0x149   : > { %1835 = vmatpush3.bf16.msra.mxu0 %v1941_v28  ;;  %v1008_v31 = vpop.f32.mrb[12].mxu1 }
 0x14a   : > { %1836 = vmatprep.subr.bf16.mxu0 %v1977_v1  ;;  %v1822_v32 = vpop.f32.mrb[13].mxu1 }
 0x14b   : > { %v2347_v33 = vpop.f32.mrb[14].mxu1 }
 0x14c   : > { %v1823_v34 = vpop.f32.mrb[15].mxu1 }
 0x14d   : > { %1837 = vmatpush3.bf16.msra.mxu0 %v1074_v30 }
 0x14e   : > { %1860 = vmatprep.subr.bf16.mxu0 %v1977_v1 }
 0x150   : > { %1839 = vmatmul.mubr.msk.bf16.vlgmr.msra.gmra.mrb[16].mxu0 %vm357_vm3, %v2098_v20  ;;  %v1944_v20 = vld [vmem:[%s2402_s3 + $0x8] sm:$0xff]  }
 0x151   : > { %1872 = vmatprep.mubr.msk.bf16.mxu0 %vm1978_vm0, %v1977_v1  ;;  %1861 = vmatpush3.bf16.msra.mxu0 %v1943_v15 }
 0x152   : > { %1862 = vmatprep.subr.bf16.mxu0 %v1977_v1 }
 0x155   : > { %1863 = vmatpush3.bf16.msra.mxu0 %v1944_v20 }
 0x156   : > { %1864 = vmatprep.subr.bf16.mxu0 %v1977_v1 }
 0x159   : > { %1865 = vmatpush3.bf16.msra.mxu0 %v1945_v39 }
 0x15a   : > { %1866 = vmatprep.subr.bf16.mxu0 %v1977_v1 }
 0x15d   : > { %1867 = vmatpush3.bf16.msra.mxu0 %v1946_v40 }
 0x15e   : > { %1868 = vmatprep.subr.bf16.mxu0 %v1977_v1 }
 0x161   : > { %1869 = vmatpush3.bf16.msra.mxu0 %v1947_v41 }
 0x162   : > { %1870 = vmatprep.subr.bf16.mxu0 %v1977_v1 }
 0x165   : > { %v1214_v35 = vpop.f32.mrb[16].mxu1  ;;  %1871 = vmatpush3.bf16.msra.mxu0 %v1948_v42 }
 0x166   : > { %v1858_v36 = vpop.f32.mrb[17].mxu1 }
 0x167   : > { %v2353_v37 = vpop.f32.mrb[18].mxu1 }
 0x168   : > { %v1859_v38 = vpop.f32.mrb[19].mxu1 }
 0x1cf   : > { %v586_v43 = vpop.f32.mrb[4].mxu0 }
 0x1d0   : > { %v1736_v44 = vpop.f32.mrb[5].mxu0 }
 0x1d1   : > { %v589_v45 = vpop.f32.mrb[6].mxu0 }
 0x1d2   : > { %v1737_v46 = vpop.f32.mrb[7].mxu0 }
 0x1eb   : > { %v733_v47 = vpop.f32.mrb[8].mxu0 }
 0x1ec   : > { %v887_v48 = vmax.f32 %v586_v43, %v733_v47  ;;  %v1770_v49 = vpop.f32.mrb[9].mxu0 }
 0x1ed   : > { %v736_v50 = vpop.f32.mrb[10].mxu0 }
 0x1ee   : > { %v888_v51 = vmax.f32 %v589_v45, %v736_v50  ;;  %v1771_v52 = vpop.f32.mrb[11].mxu0 }
 0x207   : > { %v880_v53 = vpop.f32.mrb[12].mxu0 }
 0x208   : > { %v889_v54 = vmax.f32 %v887_v48, %v880_v53  ;;  %v1804_v55 = vpop.f32.mrb[13].mxu0 }
 0x209   : > { %v883_v56 = vpop.f32.mrb[14].mxu0 }
 0x20a   : > { %v891_v1 = vsub.f32 %v586_v43, %v889_v54  ;;  %v897_v57 = vsub.f32 %v733_v47, %v889_v54  ;;  %v903_v58 = vsub.f32 %v880_v53, %v889_v54  ;;  %v890_v59 = vmax.f32 %v888_v51, %v883_v56  ;;  %v1805_v60 = vpop.f32.mrb[15].mxu0 }
 0x20c   : > { %v893_v61 = vmul.f32 1.442695, %v891_v1  ;;  %v899_v62 = vmul.f32 1.442695, %v897_v57  ;;  %v905_v63 = vmul.f32 1.442695, %v903_v58  ;;  %v892_v0 = vsub.f32 %v589_v45, %v890_v59 }
 0x20d   : > { %v898_v2 = vsub.f32 %v736_v50, %v890_v59  ;;  %v904_v3 = vsub.f32 %v883_v56, %v890_v59 }
 0x20e   : > { %1949 = vpow2.f32 %v893_v61  ;;  %v895_v4 = vmul.f32 1.442695, %v892_v0  ;;  %v1598_v61 = vld [vmem:[%s2404_s5] ss:$0 sm:$0xff] }
 0x20f   : > { %1951 = vpow2.f32 %v899_v62  ;;  %v901_v5 = vmul.f32 1.442695, %v898_v2  ;;  %v907_v6 = vmul.f32 1.442695, %v904_v3 }
 0x210   : > { %1953 = vpow2.f32 %v905_v63  ;;  %v1599_v63 = vld [vmem:[%s2405_s6] ss:$0 sm:$0xff] }
 0x211   : > { %1955 = vpow2.f32 %v895_v4 }
 0x212   : > { %1957 = vpow2.f32 %v901_v5 }
 0x213   : > { %1959 = vpow2.f32 %v907_v6 }
 0x218   : > { %v1950_v7 = vpop.eup %1949 }
 0x219   : > { %v1952_v8 = vpop.eup %1951  ;;  %v1015_v9 = vmul.f32 %v1950_v7, %v1008_v31 }
 0x21a   : > { %v1954_v10 = vpop.eup %1953  ;;  %v909_v11 = vadd.f32 %v1952_v8, %v1950_v7 }
 0x21b   : > { %v1956_v12 = vpop.eup %1955  ;;  %v1221_v13 = vmul.f32 %v1954_v10, %v1214_v35 }
 0x21c   : > { %v1958_v14 = vpop.eup %1957  ;;  %v911_v16 = vadd.f32 %v1954_v10, %v909_v11  ;;  %v1016_v17 = vmul.f32 %v1956_v12, %v2347_v33 }
 0x21d   : > { %v1960_v18 = vpop.eup %1959  ;;  %v910_v19 = vadd.f32 %v1958_v14, %v1956_v12 }
 0x21e   : > { %1961 = vrcp.f32 %v911_v16  ;;  %v1222_v21 = vmul.f32 %v1960_v18, %v2353_v37  ;;  %v1590_v37 = vld [vmem:[%s2403_s4] ss:$0 sm:$0xff] }
 0x21f   : > { %v912_v22 = vadd.f32 %v1960_v18, %v910_v19 }
 0x221   : > { %1963 = vrcp.f32 %v912_v22 }
 0x223   : > { %v1110_v23 = vpop.f32.mrb[16].mxu0 }
 0x224   : > { %v1117_v24 = vmul.f32 %v1952_v8, %v1110_v23  ;;  %v1840_v25 = vpop.f32.mrb[17].mxu0 }
 0x225   : > { %v1113_v26 = vpop.f32.mrb[18].mxu0 }
 0x226   : > { %v1119_v27 = vadd.f32 %v1117_v24, %v1015_v9  ;;  %v1118_v28 = vmul.f32 %v1958_v14, %v1113_v26  ;;  %v1841_v29 = vpop.f32.mrb[19].mxu0 }
 0x228   : > { %v1962_v30 = vpop.eup %1961  ;;  %v1223_v31 = vadd.f32 %v1221_v13, %v1119_v27  ;;  %v1120_v32 = vadd.f32 %v1118_v28, %v1016_v17 }
 0x22a   : > { %v1225_v34 = vmul.f32 %v1962_v30, %v1223_v31  ;;  %v1224_v15 = vadd.f32 %v1222_v21, %v1120_v32 }
 0x22b   : > { %v1964_v33 = vpop.eup %1963 }
 0x22c   : > { %v1226_v35 = vmul.f32 %v1964_v33, %v1224_v15 }
 0x22e   : > { %v1227_v36 = vpack.c.bf16 %v1226_v35, %v1225_v34 }
 0x230   : > { %1873 = vmatmul.mubr.msk.bf16.vlgmr.msra.gmra.mrb[20].mxu0 %vm548_vm4, %v1227_v36 }
 0x303   : > { %v1320_v20 = vpop.f32.mrb[20].mxu0 }
 0x304   : > { %v1321_v38 = vadd.f32 %v1590_v37, %v1320_v20  ;;  %v1874_v39 = vpop.f32.mrb[21].mxu0 }
 0x305   : > { %v1323_v40 = vpop.f32.mrb[22].mxu0 }
 0x306   : > { %v1324_v41 = vadd.f32 %v1590_v37, %v1323_v40  ;;  %v1875_v42 = vpop.f32.mrb[23].mxu0  ;;  %v1328_v43 = vsel %vm1327_vm5, %v1321_v38, 0.0 }
 0x307   : > { %1329 = vadd.xlane.f32.xlu0 %v1328_v43 }
 0x308   : > { %v1331_v44 = vsel %vm1327_vm5, %v1324_v41, 0.0 }
 0x30b   : > { %1332 = vadd.xlane.f32.xlu0 %v1331_v44 }
 0x394   : > { %v1330_v45 = vpop.xlane.xlu0 %1329 }
 0x395   : > { %v1335_v46 = vmul.f32 0.03125, %v1330_v45 }
 0x397   : > { %v1337_v47 = vsub.f32 %v1321_v38, %v1335_v46 }
 0x398   : > { %v1333_v48 = vpop.xlane.xlu0 %1332 }
 0x399   : > { %v1336_v49 = vmul.f32 0.03125, %v1333_v48  ;;  %v1339_v50 = vmul.f32 %v1337_v47, %v1337_v47 }
 0x39b   : > { %v1338_v51 = vsub.f32 %v1324_v41, %v1336_v49  ;;  %v1341_v52 = vsel %vm1327_vm5, %v1339_v50, 0.0 }
 0x39c   : > { %1342 = vadd.xlane.f32.xlu1 %v1341_v52 }
 0x39d   : > { %v1340_v53 = vmul.f32 %v1338_v51, %v1338_v51 }
 0x39f   : > { %v1344_v54 = vsel %vm1327_vm5, %v1340_v53, 0.0 }
 0x3a0   : > { %1345 = vadd.xlane.f32.xlu1 %v1344_v54 }
 0x429   : > { %v1343_v55 = vpop.xlane.xlu1 %1342 }
 0x42a   : > { %v1347_v56 = vmul.f32 0.03125, %v1343_v55 }
 0x42c   : > { %v1349_v1 = vadd.f32 1e-05, %v1347_v56 }
 0x42d   : > { %v1346_v57 = vpop.xlane.xlu1 %1345 }
 0x42e   : > { %1965 = vrsqrt.f32 %v1349_v1  ;;  %v1348_v58 = vmul.f32 0.03125, %v1346_v57 }
 0x430   : > { %v1350_v59 = vadd.f32 1e-05, %v1348_v58 }
 0x432   : > { %1967 = vrsqrt.f32 %v1350_v59 }
 0x438   : > { %v1966_v60 = vpop.eup %1965 }
 0x439   : > { %v1353_v62 = vmul.f32 %v1966_v60, %v1337_v47 }
 0x43b   : > { %v1362_v0 = vmul.f32 %v1598_v61, %v1353_v62 }
 0x43c   : > { %v1968_v2 = vpop.eup %1967 }
 0x43d   : > { %v1371_v3 = vadd.f32 %v1599_v63, %v1362_v0  ;;  %v1354_v4 = vmul.f32 %v1968_v2, %v1338_v51 }
 0x43f   : > { %1373 = vst.msk [vmem:[%s280_s12] sm:$0xff] %vm1327_vm5, %v1371_v3  ;;  %v1363_v5 = vmul.f32 %v1598_v61, %v1354_v4 }
 0x441   : > { %v1372_v6 = vadd.f32 %v1599_v63, %v1363_v5 }
 0x443   : > { %1374 = vst.msk [vmem:[%s280_s12 + $0x8] sm:$0xff] %vm1327_vm5, %v1372_v6 }
 0x444 PF: > { %s17_s24 = sadd.s32 1, %s1975_s24  }
 0x445   : > { %p14_p4 = scmp.ge.s32.totalorder %s17_s24, 6  }
 0x447   :  { %16 = sbr.rel (!%p14_p4) target bundleno = 1 (0x1), region = 84 }

</bundles_post_ra>
